<compile_context>
chip_gen: v5e
topology: v5e:2x2
jax: 0.10.0
libtpu: 0.0.40
codegen_flags: <defaults>
</compile_context>

<pallas_src>
import jax
import jax.numpy as jnp
from jax.experimental import pallas as pl
from jax.experimental.pallas import tpu as pltpu


_PRED_TILE_BYTES = 8 * 1024 * 1024   # per pred VMEM buffer (double-buffered by Pallas)
_NUM_SHARDS = 2                      # v7x has 2 TensorCores; harmless on v5e/v6e (1 TC)


def _round_up(x, m):
    return ((x + m - 1) // m) * m


def _nll_partial_kernel(pred_ref, rel_ref, num_ref, den_ref):
    """Accumulate per-lane partial sums of picked log-probs and pick counts."""
    i = pl.program_id(1)

    @pl.when(i == 0)
    def _init():
        num_ref[...] = jnp.zeros_like(num_ref)
        den_ref[...] = jnp.zeros_like(den_ref)

    pred = pred_ref[...].astype(jnp.float32)     # (TILE, GC); per-tile cast (bf16 ok)
    rel = rel_ref[...].astype(jnp.int32)         # (TILE, G)  target lane per row group

    tile_rows, gc = pred.shape
    g_count = rel.shape[1]
    c = gc // g_count

    lane = jax.lax.broadcasted_iota(jnp.int32, (1, gc), 1)   # small constant iota

    # Expand per-(row, group) target lane to per-(row, lane): G-1 selects against
    # constant lane thresholds (groups occupy consecutive lane ranges), then ONE compare.
    rel_e = rel[:, 0:1]
    for g in range(1, g_count):
        rel_e = jnp.where(lane >= g * c, rel[:, g:g + 1], rel_e)
    match = lane == rel_e            # padded / invalid rows (rel == -1) never match

    # Select (not multiply) so undefined data in a partial tail block cannot poison sums.
    picked = jnp.where(match, pred, 0.0)
    count = jnp.where(match, 1.0, 0.0)

    # Fold TILE rows onto 8 sublanes with vreg-aligned adds; the cross-sublane/lane
    # reduce and the class-weight multiply happen once, in the wrapper epilogue.
    num_ref[...] += picked.reshape(tile_rows // 8, 8, gc).sum(axis=0)
    den_ref[...] += count.reshape(tile_rows // 8, 8, gc).sum(axis=0)


def get_loss(pred, target, trans_feat=None, weight=None):
    """JAX/Pallas equivalent of the PyTorch get_loss.forward.

    pred:   (N, C) float32 / bfloat16 log-probabilities
    target: (N,)   integer class indices
    weight: (C,)   per-class weights (None -> unweighted, like F.nll_loss default)
    trans_feat: unused (kept for signature parity with the PyTorch module)
    """
    del trans_feat  # unused, same as the PyTorch module
    N, C = pred.shape
    target = target.astype(jnp.int32)
    if weight is None:
        weight = jnp.ones((C,), dtype=jnp.float32)
    weight = weight.astype(jnp.float32)

    # Lane-packing factor: fold G consecutive rows into one (up to) 128-lane packed row.
    # G must divide N so the (N, C) -> (N/G, G*C) reshape is a free row-major fold.
    g_cap = max(1, min(128 // C, 8)) if C <= 128 else 1
    G = 1
    for cand in (8, 4, 2):
        if cand <= g_cap and N % cand == 0:
            G = cand
            break
    GC = G * C
    n_pack = N // G
    pred_packed = pred.reshape(n_pack, GC)       # free fold: no pad, no cast, no copy

    # Tile sizing: ~8 MiB pred tiles amortize per-grid-step overhead; double-buffered
    # pred + int8 rel buffers + two (8, GC) partial outputs stay well inside 32 MiB.
    bytes_per_row = GC * pred.dtype.itemsize
    target_rows = max(32, (_PRED_TILE_BYTES // bytes_per_row) // 32 * 32)
    tile = min(_round_up(n_pack, 32), target_rows)

    n_blocks = -(-n_pack // tile)                # valid pred blocks
    steps = -(-n_blocks // _NUM_SHARDS)          # inner ("arbitrary") steps per shard
    n_rel_rows = _NUM_SHARDS * steps * tile      # rel is padded to the full grid extent

    # Per-row target lane inside its packed row; -1 (ignore) for invalid / padded rows.
    idx = jnp.arange(N, dtype=jnp.int32)
    valid = (target >= 0) & (target < C)
    rel_rows = jnp.where(valid, (idx % G) * C + target, -1)
    rel_dtype = jnp.int8 if GC <= 128 else jnp.int32   # int8: 4x fewer HBM/VMEM bytes
    rel = jnp.full((n_rel_rows * G,), -1, dtype=rel_dtype)
    rel = rel.at[:N].set(rel_rows.astype(rel_dtype)).reshape(n_rel_rows, G)

    last_blk = n_blocks - 1

    def pred_map(s, i):
        # Clamp steps that fall past the end of pred onto the last valid block; their
        # rows are fully masked anyway because the padded rel block there is all -1.
        return (jnp.minimum(s * steps + i, last_blk), 0)

    def rel_map(s, i):
        return (s * steps + i, 0)

    num_part, den_part = pl.pallas_call(
        _nll_partial_kernel,
        out_shape=(
            jax.ShapeDtypeStruct((_NUM_SHARDS, 8, GC), jnp.float32),
            jax.ShapeDtypeStruct((_NUM_SHARDS, 8, GC), jnp.float32),
        ),
        grid=(_NUM_SHARDS, steps),
        in_specs=[
            pl.BlockSpec((tile, GC), pred_map),   # packed log-prob tiles (streamed)
            pl.BlockSpec((tile, G), rel_map),     # packed int8 relative targets
        ],
        out_specs=(
            pl.BlockSpec((None, 8, GC), lambda s, i: (s, 0, 0)),   # per-shard partials
            pl.BlockSpec((None, 8, GC), lambda s, i: (s, 0, 0)),
        ),
        compiler_params=pltpu.CompilerParams(
            dimension_semantics=("parallel", "arbitrary"),
            vmem_limit_bytes=32 * 1024 * 1024,
        ),
    )(pred_packed, rel)

    # Tiny epilogue: apply class weights once per lane and reduce the per-core partials.
    w_tiled = jnp.tile(weight, G)                                   # (GC,)
    num = jnp.sum(num_part.sum(axis=(0, 1)) * w_tiled)
    den = jnp.sum(den_part.sum(axis=(0, 1)) * w_tiled)
    return -(num / den)


if __name__ == "__main__":
    key = jax.random.PRNGKey(0)
    k1, k2, k3 = jax.random.split(key, 3)

    N, C = 8, 32  # small: 8 samples, 32 classes

    logits = jax.random.normal(k1, (N, C), dtype=jnp.float32)
    pred = jax.nn.log_softmax(logits, axis=-1)                 # log-probabilities
    target = jax.random.randint(k2, (N,), 0, C, dtype=jnp.int32)
    weight = jax.random.uniform(k3, (C,), dtype=jnp.float32,
                                minval=0.5, maxval=1.5)
    trans_feat = jnp.zeros((N, 3, 3), dtype=jnp.float32)       # unused, parity only

    loss = get_loss(pred, target, trans_feat, weight)
    loss = jax.block_until_ready(loss)

    # reference check against pure-JAX weighted NLL (mean reduction)
    picked_logp = pred[jnp.arange(N), target]
    picked_w = weight[target]
    ref = -(picked_w * picked_logp).sum() / picked_w.sum()
    assert jnp.allclose(loss, ref, rtol=1e-5, atol=1e-5), (loss, ref)

    print("KERNEL_OK")
</pallas_src>

<mosaic_0001>
module attributes {stable_mosaic.version = 11 : i64} {
  func.func @_nll_partial_kernel(%arg0: i32, %arg1: i32, %arg2: memref<32x128xf32, #tpu.memory_space<vmem>>, %arg3: memref<32x4xi8, #tpu.memory_space<vmem>>, %arg4: memref<1x8x128xf32, #tpu.memory_space<vmem>>, %arg5: memref<1x8x128xf32, #tpu.memory_space<vmem>>) attributes {dimension_semantics = [#tpu.dimension_semantics<parallel>, #tpu.dimension_semantics<arbitrary>], iteration_bounds = array<i64: 2, 1>, scalar_prefetch = 0 : i64, scratch_operands = 0 : i64, tpu.core_type = #tpu.core_type<tc>, window_params = [{transform_indices = @transform_0, window_bounds = array<i64: 32, 128>}, {transform_indices = @transform_1, window_bounds = array<i64: 32, 4>}, {transform_indices = @transform_2, window_bounds = array<i64: 1, 8, 128>}, {transform_indices = @transform_3, window_bounds = array<i64: 1, 8, 128>}]} {
    %c0_i32 = arith.constant 0 : i32
    %0 = arith.cmpi eq, %arg1, %c0_i32 : i32
    %1 = arith.extui %0 : i1 to i32
    %c0_i32_0 = arith.constant 0 : i32
    %2 = arith.cmpi ne, %1, %c0_i32_0 : i32
    scf.if %2 {
      %cst_20 = arith.constant 0.000000e+00 : f32
      %57 = vector.broadcast %cst_20 : f32 to vector<8x128xf32>
      %c0_21 = arith.constant 0 : index
      %c0_22 = arith.constant 0 : index
      %c0_23 = arith.constant 0 : index
      %58 = vector.load %arg4[%c0_21, %c0_22, %c0_23] : memref<1x8x128xf32, #tpu.memory_space<vmem>>, vector<1x8x128xf32>
      %59 = vector.shape_cast %58 : vector<1x8x128xf32> to vector<8x128xf32>
      %60 = vector.shape_cast %57 : vector<8x128xf32> to vector<1x8x128xf32>
      tpu.vector_store %arg4[%c0_21, %c0_22, %c0_23], %60 {strides = array<i32>} : memref<1x8x128xf32, #tpu.memory_space<vmem>>, vector<1x8x128xf32>,
      %cst_24 = arith.constant 0.000000e+00 : f32
      %61 = vector.broadcast %cst_24 : f32 to vector<8x128xf32>
      %c0_25 = arith.constant 0 : index
      %c0_26 = arith.constant 0 : index
      %c0_27 = arith.constant 0 : index
      %62 = vector.load %arg5[%c0_25, %c0_26, %c0_27] : memref<1x8x128xf32, #tpu.memory_space<vmem>>, vector<1x8x128xf32>
      %63 = vector.shape_cast %62 : vector<1x8x128xf32> to vector<8x128xf32>
      %64 = vector.shape_cast %61 : vector<8x128xf32> to vector<1x8x128xf32>
      tpu.vector_store %arg5[%c0_25, %c0_26, %c0_27], %64 {strides = array<i32>} : memref<1x8x128xf32, #tpu.memory_space<vmem>>, vector<1x8x128xf32>,
    } else {
    }
    %c0 = arith.constant 0 : index
    %c0_1 = arith.constant 0 : index
    %3 = vector.load %arg2[%c0, %c0_1] : memref<32x128xf32, #tpu.memory_space<vmem>>, vector<32x128xf32>
    %c0_2 = arith.constant 0 : index
    %c0_3 = arith.constant 0 : index
    %4 = vector.load %arg3[%c0_2, %c0_3] : memref<32x4xi8, #tpu.memory_space<vmem>>, vector<32x4xi8>
    %5 = arith.extsi %4 : vector<32x4xi8> to vector<32x4xi32>
    %6 = tpu.iota {dimensions = array<i32: 1>} : vector<1x128xi32>
    %7 = vector.extract_strided_slice %5 {offsets = [0, 0], sizes = [32, 1], strides = [1, 1]} : vector<32x4xi32> to vector<32x1xi32>
    %c32_i32 = arith.constant 32 : i32
    %8 = vector.broadcast %c32_i32 : i32 to vector<1x128xi32>
    %9 = arith.cmpi sge, %6, %8 : vector<1x128xi32>
    %10 = vector.extract_strided_slice %5 {offsets = [0, 1], sizes = [32, 1], strides = [1, 1]} : vector<32x4xi32> to vector<32x1xi32>
    %11 = vector.shape_cast %9 : vector<1x128xi1> to vector<1x128xi1>
    %12 = vector.broadcast %11 : vector<1x128xi1> to vector<32x128xi1>
    %13 = vector.shape_cast %10 : vector<32x1xi32> to vector<32x1xi32>
    %14 = vector.broadcast %13 : vector<32x1xi32> to vector<32x128xi32>
    %15 = vector.shape_cast %7 : vector<32x1xi32> to vector<32x1xi32>
    %16 = vector.broadcast %15 : vector<32x1xi32> to vector<32x128xi32>
    %17 = arith.select %12, %14, %16 : vector<32x128xi1>, vector<32x128xi32>
    %c64_i32 = arith.constant 64 : i32
    %18 = vector.broadcast %c64_i32 : i32 to vector<1x128xi32>
    %19 = arith.cmpi sge, %6, %18 : vector<1x128xi32>
    %20 = vector.extract_strided_slice %5 {offsets = [0, 2], sizes = [32, 1], strides = [1, 1]} : vector<32x4xi32> to vector<32x1xi32>
    %21 = vector.shape_cast %19 : vector<1x128xi1> to vector<1x128xi1>
    %22 = vector.broadcast %21 : vector<1x128xi1> to vector<32x128xi1>
    %23 = vector.shape_cast %20 : vector<32x1xi32> to vector<32x1xi32>
    %24 = vector.broadcast %23 : vector<32x1xi32> to vector<32x128xi32>
    %25 = arith.select %22, %24, %17 : vector<32x128xi1>, vector<32x128xi32>
    %c96_i32 = arith.constant 96 : i32
    %26 = vector.broadcast %c96_i32 : i32 to vector<1x128xi32>
    %27 = arith.cmpi sge, %6, %26 : vector<1x128xi32>
    %28 = vector.extract_strided_slice %5 {offsets = [0, 3], sizes = [32, 1], strides = [1, 1]} : vector<32x4xi32> to vector<32x1xi32>
    %29 = vector.shape_cast %27 : vector<1x128xi1> to vector<1x128xi1>
    %30 = vector.broadcast %29 : vector<1x128xi1> to vector<32x128xi1>
    %31 = vector.shape_cast %28 : vector<32x1xi32> to vector<32x1xi32>
    %32 = vector.broadcast %31 : vector<32x1xi32> to vector<32x128xi32>
    %33 = arith.select %30, %32, %25 : vector<32x128xi1>, vector<32x128xi32>
    %34 = vector.broadcast %6 : vector<1x128xi32> to vector<32x128xi32>
    %35 = arith.cmpi eq, %34, %33 : vector<32x128xi32>
    %cst = arith.constant 0.000000e+00 : f32
    %36 = vector.broadcast %cst : f32 to vector<32x128xf32>
    %37 = arith.select %35, %3, %36 : vector<32x128xi1>, vector<32x128xf32>
    %cst_4 = arith.constant 1.000000e+00 : f32
    %cst_5 = arith.constant 0.000000e+00 : f32
    %38 = vector.broadcast %cst_4 : f32 to vector<32x128xf32>
    %39 = vector.broadcast %cst_5 : f32 to vector<32x128xf32>
    %40 = arith.select %35, %38, %39 : vector<32x128xi1>, vector<32x128xf32>
    %c0_6 = arith.constant 0 : index
    %c0_7 = arith.constant 0 : index
    %c0_8 = arith.constant 0 : index
    %41 = vector.load %arg4[%c0_6, %c0_7, %c0_8] : memref<1x8x128xf32, #tpu.memory_space<vmem>>, vector<1x8x128xf32>
    %42 = vector.shape_cast %41 : vector<1x8x128xf32> to vector<8x128xf32>
    %43 = vector.shape_cast %37 : vector<32x128xf32> to vector<4x8x128xf32>
    %cst_9 = arith.constant dense<0.000000e+00> : vector<8x128xf32>
    %44 = vector.multi_reduction <add>, %43, %cst_9 [0] : vector<4x8x128xf32> to vector<8x128xf32>
    %45 = arith.addf %42, %44 : vector<8x128xf32>
    %c0_10 = arith.constant 0 : index
    %c0_11 = arith.constant 0 : index
    %c0_12 = arith.constant 0 : index
    %46 = vector.load %arg4[%c0_10, %c0_11, %c0_12] : memref<1x8x128xf32, #tpu.memory_space<vmem>>, vector<1x8x128xf32>
    %47 = vector.shape_cast %46 : vector<1x8x128xf32> to vector<8x128xf32>
    %48 = vector.shape_cast %45 : vector<8x128xf32> to vector<1x8x128xf32>
    tpu.vector_store %arg4[%c0_10, %c0_11, %c0_12], %48 {strides = array<i32>} : memref<1x8x128xf32, #tpu.memory_space<vmem>>, vector<1x8x128xf32>,
    %c0_13 = arith.constant 0 : index
    %c0_14 = arith.constant 0 : index
    %c0_15 = arith.constant 0 : index
    %49 = vector.load %arg5[%c0_13, %c0_14, %c0_15] : memref<1x8x128xf32, #tpu.memory_space<vmem>>, vector<1x8x128xf32>
    %50 = vector.shape_cast %49 : vector<1x8x128xf32> to vector<8x128xf32>
    %51 = vector.shape_cast %40 : vector<32x128xf32> to vector<4x8x128xf32>
    %cst_16 = arith.constant dense<0.000000e+00> : vector<8x128xf32>
    %52 = vector.multi_reduction <add>, %51, %cst_16 [0] : vector<4x8x128xf32> to vector<8x128xf32>
    %53 = arith.addf %50, %52 : vector<8x128xf32>
    %c0_17 = arith.constant 0 : index
    %c0_18 = arith.constant 0 : index
    %c0_19 = arith.constant 0 : index
    %54 = vector.load %arg5[%c0_17, %c0_18, %c0_19] : memref<1x8x128xf32, #tpu.memory_space<vmem>>, vector<1x8x128xf32>
    %55 = vector.shape_cast %54 : vector<1x8x128xf32> to vector<8x128xf32>
    %56 = vector.shape_cast %53 : vector<8x128xf32> to vector<1x8x128xf32>
    tpu.vector_store %arg5[%c0_17, %c0_18, %c0_19], %56 {strides = array<i32>} : memref<1x8x128xf32, #tpu.memory_space<vmem>>, vector<1x8x128xf32>,
    return
  }
  func.func @transform_0(%arg0: i32, %arg1: i32) -> (i32, i32) {
    %c1_i32 = arith.constant 1 : i32
    %0 = arith.muli %arg0, %c1_i32 : i32
    %1 = arith.addi %0, %arg1 : i32
    %c0_i32 = arith.constant 0 : i32
    %2 = arith.minsi %1, %c0_i32 : i32
    %c0_i32_0 = arith.constant 0 : i32
    %c0_i32_1 = arith.constant 0 : i32
    return %2, %c0_i32_0 : i32, i32
  }
  func.func @transform_1(%arg0: i32, %arg1: i32) -> (i32, i32) {
    %c1_i32 = arith.constant 1 : i32
    %0 = arith.muli %arg0, %c1_i32 : i32
    %1 = arith.addi %0, %arg1 : i32
    %c0_i32 = arith.constant 0 : i32
    %c0_i32_0 = arith.constant 0 : i32
    return %1, %c0_i32 : i32, i32
  }
  func.func @transform_2(%arg0: i32, %arg1: i32) -> (i32, i32, i32) {
    %c0_i32 = arith.constant 0 : i32
    %c0_i32_0 = arith.constant 0 : i32
    %c0_i32_1 = arith.constant 0 : i32
    return %arg0, %c0_i32, %c0_i32_0 : i32, i32, i32
  }
  func.func @transform_3(%arg0: i32, %arg1: i32) -> (i32, i32, i32) {
    %c0_i32 = arith.constant 0 : i32
    %c0_i32_0 = arith.constant 0 : i32
    %c0_i32_1 = arith.constant 0 : i32
    return %arg0, %c0_i32, %c0_i32_0 : i32, i32, i32
  }
}

</mosaic_0001>

<bundles_post_ra>
// kernel: tpu_custom_call.1
= control target key start
LH: loop header
LB: loop body
LE: loop exit
PB: predicated region body
PF: predicated region fallthrough
CT: control target
= control target key end

     0   :  { %9 = vsyncpa [#allocation3], 0  ;;  %s889_s0 = inlined_call_operand.vmem [shape: f32[2,128], index: 0, kind: input, shape index: {}]   ;;  %s890_s1 = inlined_call_operand.vmem [shape: s8[64,4], index: 1, kind: input, shape index: {}]   ;;  %s891_s2 = inlined_call_operand.hbm [shape: f32[2,8,128], index: 2, kind: output, shape index: {0}]   ;;  %s892_s3 = inlined_call_operand.hbm [shape: f32[2,8,128], index: 3, kind: output, shape index: {1}]  }
   0x1   :  { %11 = vsyncpa [#allocation3 + $0x1], 0 }
   0x2   :  { %12 = vsyncpa [#allocation5], 0 }
   0x3   :  { %14 = vsyncpa [#allocation5 + $0x1], 0  ;;  %s751_s12 = smov 0   ;;  %s753_s13 = smov 0  }
   0x4   :  { %s755_s14 = smov 0   ;;  %s757_s15 = smov 0  }
   0x5   :  { %s759_s16 = smov 0   ;;  %s761_s17 = smov 0  }
   0x6 LB: > { %s514_s18 = sadd.s32 4294967295, %s724_s17   ;;  %s515_s19 = sadd.s32 4294967294, %s724_s17   ;;  %s724_s17 = sphi %s761_s17, %s20_s17   ;;  %s720_s16 = sphi %s759_s16, %s899_s16   ;;  %s716_s15 = sphi %s757_s15, %s898_s15   ;;  %s712_s14 = sphi %s755_s14, %s897_s14   ;;  %s708_s13 = sphi %s753_s13, %s896_s13   ;;  %s704_s12 = sphi %s751_s12, %s895_s12  }
   0x7   : > { %s32_s20 = sadd.s32 1, %s720_s16  ;;  %s99_s21 = sadd.s32 1, %s712_s14 }
   0x8   : > { %p34_p0 = scmp.ge.s32.totalorder %s32_s20, 2  ;;  %p109_p1 = scmp.ne.s32.totalorder %s712_s14, %s708_s13 }
   0x9   : > { %p110_p2 = scmp.eq.s32.totalorder %s514_s18, 1  ;;  %p115_p3 = scmp.ne.s32.totalorder %s708_s13, %s704_s12 }
   0xa   : > { %s901_s20 = smov (%p34_p0, %s32_s20), 0  ;;  %p116_p5 = scmp.eq.s32.totalorder %s515_s19, 1 }
   0xb   : > { %p791_p4 = por %p110_p2, %p109_p1  ;;  %s96_s23 = ssub.s32 %s720_s16, %s901_s20 }
   0xc   : > { %p518_p6 = scmp.ge.s32.totalorder %s724_s17, 1  ;;  %p97_p7 = scmp.eq.s32.totalorder %s96_s23, 0 }
   0xd   : > { %p798_p8 = por %p116_p5, %p115_p3  ;;  %p190_p9 = scmp.lt.s32.totalorder %s724_s17, 3 }
   0xe   : > { %s804_s25 = scalar_select %p97_p7, %s712_s14, %s99_s21  }
   0xf   : > { %p191_p10 = pnand %p518_p6, %p190_p9 }
  0x10   : > { %s523_s26 = sshll.u32 (!%p191_p10), %s716_s15, 2  ;;  %p231_p12 = scmp.lt.s32.totalorder (!%p191_p10), %s716_s15, 0 }
  0x11   : > { %194 = sbr.rel (%p191_p10) target bundleno = 206 (0xce), region = 28  ;;  %p248_p11 = scmp.lt.s32.totalorder (!%p191_p10), %s523_s26, 7 }
  0x12   : > { %s825_s10 = sand.u32 (!%p191_p10), 1, %s708_s13   ;;  %s527_s18 = sshll.u32 (!%p191_p10), %s716_s15, 3 }
  0x13   : > { %s519_s11 = sshll.u32 (!%p191_p10), %s825_s10, 3  ;;  %s383_s23 = scalar_lea.hbm (!%p191_p10), %s891_s2, %s527_s18 }
  0x14   : > { %s222_s28 = scalar_lea.vmem (!%p191_p10), [#allocation2], %s519_s11  ;;  %s368_s7 = scalar_lea.sflag (!%p191_p10), [#allocation3], %s825_s10 }
  0x15   : > { %s385_s29 = sshll.u32 (!%p191_p10), %s222_s28, 4  ;;  %s386_s29 = int_to_ptr.vmem [resolvable:$true] %s385_s29 }
  0x16   : > { %v726_v0 = vmov 1   ;;  %v727_v1 = vmov 0   ;;  %s903_s26 = smov (!%p248_p11, %s523_s26), 7  ;;  %v728_v7 = vmov 2   ;;  %v729_v8 = vmov 3  }
  0x17   : > { %606 = vset.pattern.permute.xlu1 %v726_v0  ;;  %605 = vset.pattern.permute.xlu0 %v726_v0  ;;  %s524_s27 = sshll.u32 %s903_s26, 1  ;;  %v272_v17 = vlaneseq  ;;  %v730_v38 = vmov 0.0  }
  0x18   : > { %607 = vset.pattern.permute.xlu2 %v727_v1  ;;  %s251_s30 = scalar_lea.vmem %s890_s1, %s524_s27  ;;  %s397_s27 = scalar_lea.hbm %s892_s3, %s527_s18 }
  0x19   : > { %v539_v2 = vld [vmem:[%s251_s30] sm:$0xff]   ;;  %s232_s4 = scalar_select %p231_p12, %s716_s15, 0  ;;  %v273_v18 = vand.u32 127, %v272_v17 }
  0x1a   : > { %v537_v3 = vunpack.c.2.s8 %v539_v2  ;;  %v533_v4 = vunpack.c.0.s8 %v539_v2  ;;  %v538_v5 = vunpack.c.3.s8 %v539_v2  ;;  %v534_v6 = vunpack.c.1.s8 %v539_v2  ;;  %s387_s30 = sshll.u32 %s383_s23, 4  ;;  %s388_s30 = int_to_ptr.hbm [resolvable:$true] %s387_s30 }
  0x1b   : > { %s521_s5 = sshll.u32 %s232_s4, 4  ;;  %vm274_vm0 = vcmp.ge.s32.totalorder %v273_v18, 32  ;;  %vm305_vm1 = vcmp.ge.s32.totalorder %v273_v18, 64  ;;  %vm324_vm2 = vcmp.ge.s32.totalorder %v273_v18, 96  ;;  %s229_s4 = scalar_lea.vmem [#allocation4], %s519_s11 }
  0x1c   : > { %284 = vperm.xlu1 %606, %v537_v3   ;;  %278 = vperm.xlu0 %605, %v533_v4   ;;  %p236_p13 = scmp.lt.s32.totalorder %s521_s5, 0  ;;  %s628_s8 = sshra.s32 %s388_s30, 4  ;;  %s629_s8 = int_to_ptr.hbm [resolvable:$true] %s628_s8 }
  0x1d   : > { %290 = vperm.xlu2 %607, %v533_v4   ;;  %s634_s11 = scalar_lea.hbm %s891_s2, 16  ;;  %p635_p3 = scmp.lt.s32.totalorder %s629_s8, %s891_s2 }
  0x1e   : > { %s905_s5 = smov (!%p236_p13, %s521_s5), 0 }
  0x1f   : > { %s522_s6 = sshll.u32 %s905_s5, 1  ;;  %s399_s5 = sshll.u32 %s229_s4, 4  ;;  %s838_s5 = int_to_ptr.vmem [resolvable:$true] %s399_s5 }
  0x20   : > { %s239_s9 = scalar_lea.vmem %s889_s0, %s522_s6  ;;  %s401_s6 = sshll.u32 %s397_s27, 4  ;;  %s840_s6 = int_to_ptr.hbm [resolvable:$true] %s401_s6 }
  0x21   : > { %v261_v34 = vld [vmem:[%s239_s9 + $0x8] sm:$0xff]  ;;  %v260_v35 = vld [vmem:[%s239_s9] sm:$0xff]  ;;  %v262_v36 = vld [vmem:[%s239_s9 + $0x10] sm:$0xff] }
  0x22   : > { %v263_v49 = vld [vmem:[%s239_s9 + $0x18] sm:$0xff]  ;;  %s630_s9 = scalar_lea.hbm %s629_s8, 8 }
  0x23   : > { %p631_p0 = scmp.ne.s32.totalorder %s629_s8, %s630_s9  ;;  %p636_p5 = scmp.lt.s32.totalorder %s634_s11, %s630_s9 }
  0x24   : > { %287 = vperm.xlu1 %606, %v538_v5   ;;  %281 = vperm.xlu0 %605, %v534_v6  }
  0x25   : > { %293 = vperm.xlu2 %607, %v534_v6   ;;  %p632_p1 = pnand %p631_p0, %p791_p4  ;;  %p637_p6 = por %p636_p5, %p635_p3 }
  0x27   : > { %p633_p2 = pneg %p632_p1 }
  0x29   : > { %p638_p7 = pnand %p637_p6, %p633_p2 }
  0x2c   : > { %609 = vset.pattern.permute.xlu1 %v727_v1  ;;  %608 = vset.pattern.permute.xlu0 %v727_v1 }
  0x2d   : > { %299 = vperm.xlu1 %609, %v538_v5   ;;  %610 = vset.pattern.permute.xlu2 %v728_v7 }
  0x2e   : > { %296 = vperm.xlu0 %608, %v537_v3   ;;  %309 = vperm.xlu2 %610, %v533_v4  }
  0x35   : > { %611 = vset.pattern.permute.xlu1 %v728_v7 }
  0x36   : > { %312 = vperm.xlu1 %611, %v534_v6   ;;  %612 = vset.pattern.permute.xlu2 %v729_v8 }
  0x37   : > { %613 = vset.pattern.permute.xlu0 %v729_v8  ;;  %328 = vperm.xlu2 %612, %v533_v4  }
  0x38   : > { %331 = vperm.xlu0 %613, %v534_v6  }
  0x3e   : > { %315 = vperm.xlu1 %611, %v537_v3  }
  0x3f   : > { %334 = vperm.xlu2 %612, %v537_v3  }
  0x46   : > { %318 = vperm.xlu1 %611, %v538_v5  }
  0x47   : > { %337 = vperm.xlu2 %612, %v538_v5  }
  0x77   : > { %v291_v9 = vpop.permute.xlu2 %290 }
  0x7f   : > { %v294_v12 = vpop.permute.xlu2 %293 }
  0x88   : > { %v310_v15 = vpop.permute.xlu2 %309 }
  0x8e   : > { %v285_v10 = vpop.permute.xlu1 %284  ;;  %v279_v11 = vpop.permute.xlu0 %278 }
  0x8f   : > { %v301_v22 = vsel %vm274_vm0, %v279_v11, %v291_v9 }
  0x90   : > { %v320_v26 = vsel %vm305_vm1, %v310_v15, %v301_v22 }
  0x91   : > { %v329_v20 = vpop.permute.xlu2 %328 }
  0x92   : > { %v339_v31 = vsel %vm324_vm2, %v329_v20, %v320_v26 }
  0x93   : > { %vm343_vm4 = vcmp.eq.s32.totalorder %v273_v18, %v339_v31 }
  0x94   : > { %v347_v40 = vsel %vm343_vm4, %v260_v35, 0.0  ;;  %v351_v41 = vsel %vm343_vm4, 1.0, %v730_v38 }
  0x96   : > { %v288_v13 = vpop.permute.xlu1 %287  ;;  %v282_v14 = vpop.permute.xlu0 %281 }
  0x97   : > { %v302_v23 = vsel %vm274_vm0, %v282_v14, %v294_v12 }
  0x99   : > { %v335_v27 = vpop.permute.xlu2 %334 }
  0x9f   : > { %v300_v16 = vpop.permute.xlu1 %299 }
  0xa0   : > { %v297_v19 = vpop.permute.xlu0 %296  ;;  %v304_v42 = vsel %vm274_vm0, %v288_v13, %v300_v16 }
  0xa1   : > { %v303_v28 = vsel %vm274_vm0, %v285_v10, %v297_v19  ;;  %v338_v46 = vpop.permute.xlu2 %337 }
  0xa8   : > { %v313_v21 = vpop.permute.xlu1 %312 }
  0xa9   : > { %v321_v24 = vsel %vm305_vm1, %v313_v21, %v302_v23 }
  0xaa   : > { %v332_v25 = vpop.permute.xlu0 %331 }
  0xab   : > { %v340_v29 = vsel %vm324_vm2, %v332_v25, %v321_v24 }
  0xac   : > { %vm344_vm3 = vcmp.eq.s32.totalorder %v273_v18, %v340_v29 }
  0xad   : > { %v348_v37 = vsel %vm344_vm3, %v261_v34, 0.0  ;;  %v352_v39 = vsel %vm344_vm3, 1.0, %v730_v38 }
  0xae   : > { %v356_v47 = vadd.f32 %v348_v37, %v347_v40  ;;  %v362_v48 = vadd.f32 %v352_v39, %v351_v41 }
  0xb0   : > { %v316_v30 = vpop.permute.xlu1 %315 }
  0xb1   : > { %v322_v32 = vsel %vm305_vm1, %v316_v30, %v303_v28 }
  0xb2   : > { %v341_v33 = vsel %vm324_vm2, %v335_v27, %v322_v32 }
  0xb3   : > { %vm345_vm5 = vcmp.eq.s32.totalorder %v273_v18, %v341_v33 }
  0xb4   : > { %v349_v43 = vsel %vm345_vm5, %v262_v36, 0.0  ;;  %v353_v44 = vsel %vm345_vm5, 1.0, %v730_v38 }
  0xb5   : > { %v357_v52 = vadd.f32 %v356_v47, %v349_v43  ;;  %v363_v53 = vadd.f32 %v362_v48, %v353_v44 }
  0xb8   : > { %v319_v45 = vpop.permute.xlu1 %318 }
  0xb9   : > { %v323_v50 = vsel %vm305_vm1, %v319_v45, %v304_v42 }
  0xba   : > { %v342_v51 = vsel %vm324_vm2, %v338_v46, %v323_v50 }
  0xbb   : > { %vm346_vm6 = vcmp.eq.s32.totalorder %v273_v18, %v342_v51 }
  0xbc   : > { %v350_v54 = vsel %vm346_vm6, %v263_v49, 0.0  ;;  %v354_v55 = vsel %vm346_vm6, 1.0, %v730_v38 }
  0xbd   : > { %v358_v56 = vadd.f32 %v357_v52, %v350_v54  ;;  %v364_v57 = vadd.f32 %v363_v53, %v354_v55 }
  0xbf   : > { %360 = vst [vmem:[%s222_s28] sm:$0xff] %v358_v56 }
  0xc0   : > { %641 = shalt.err (!%p638_p7)
}
  0xc1   : > { %540 = dma.vmem_to_hbm [thread:$0]  (%p791_p4), %s386_s29, 128, %s388_s30, %s368_s7   ;;  %366 = vst [vmem:[%s229_s4] sm:$0xff] %v364_v57 }
  0xc2   : > { %s373_s15 = scalar_lea.sflag [#allocation5], %s825_s10  ;;  %s656_s26 = sshra.s32 %s840_s6, 4  ;;  %s657_s26 = int_to_ptr.hbm [resolvable:$true] %s656_s26 }
  0xc3   : > { %s658_s27 = scalar_lea.hbm %s657_s26, 8  ;;  %s662_s9 = scalar_lea.hbm %s892_s3, 16 }
  0xc4   : > { %p659_p9 = scmp.ne.s32.totalorder %s657_s26, %s658_s27  ;;  %p663_p12 = scmp.lt.s32.totalorder %s657_s26, %s892_s3 }
  0xc5   : > { %p664_p13 = scmp.lt.s32.totalorder %s662_s9, %s658_s27 }
  0xc6   : > { %p660_p10 = pnand %p659_p9, %p791_p4 }
  0xc7   : > { %p665_p0 = por %p664_p13, %p663_p12 }
  0xc8   : > { %p661_p11 = pneg %p660_p10 }
  0xca   : > { %p666_p1 = pnand %p665_p0, %p661_p11 }
  0xcc   : > { %669 = shalt.err (!%p666_p1)
}
  0xcd   : > { %541 = dma.vmem_to_hbm [thread:$0]  (%p791_p4), %s838_s5, 128, %s840_s6, %s373_s15  }
  0xce PF: > { %p551_p2 = scmp.ge.s32.totalorder %s724_s17, 2  ;;  %s413_s10 = sand.u32 1, %s704_s12  }
  0xcf   : > { %s414_s29 = scalar_lea.sflag [#allocation3], %s413_s10 }
  0xd0   : > { %p545_p3 = pnand %p551_p2, %p798_p8 }
  0xd2   : > { %p546_p5 = pneg %p545_p3 }
  0xd4   : > { %695 = dma.done.wait (%p546_p5), %s414_s29, 128  }
  0xd5   : > { %697 = vsyncadd (%p546_p5), %s414_s29, 4294967168  ;;  %s424_s30 = scalar_lea.sflag [#allocation5], %s413_s10 }
  0xd6   : > { %699 = dma.done.wait (%p546_p5), %s424_s30, 128  }
  0xd7   : > { %701 = vsyncadd (%p546_p5), %s424_s30, 4294967168  ;;  %s20_s17 = sadd.s32 1, %s724_s17   ;;  %s895_s12 = smov %s708_s13 }
  0xd8   : > { %p17_p6 = scmp.ge.s32.totalorder %s20_s17, 4   ;;  %s896_s13 = smov %s712_s14 }
  0xd9   : > { %s897_s14 = smov %s804_s25  ;;  %s898_s15 = smov %s720_s16 }
  0xda   : > { %s899_s16 = smov %s901_s20  ;;  %19 = sbr.rel (!%p17_p6) target bundleno = 6 (0x6), region = 87 }
  0xdf   :  { %430 = vsyncpa [#allocation3], 1 }
  0xe0   :  { %432 = vsyncpa [#allocation3 + $0x1], 1 }
  0xe1   :  { %433 = vsyncpa [#allocation5], 1 }
  0xe2   :  { %435 = vsyncpa [#allocation5 + $0x1], 1 }

</bundles_post_ra>
